<compile_context>
chip_gen: v7x
topology: tpu7x:2x2x1
jax: 0.10.0
libtpu: 0.0.40
codegen_flags: <defaults>
</compile_context>

<pallas_src>
import jax
import jax.numpy as jnp
from jax import lax
from jax.experimental import pallas as pl
from jax.experimental.pallas import tpu as pltpu

VMEM_SPEC = pl.BlockSpec(memory_space=pltpu.MemorySpace.VMEM)

NEG_SLOPE = 0.01          # nn.LeakyReLU default
_MASK_VAL = -(2.0 ** 30)  # segment-max fill; exactly representable in bf16 & f32
ROW_TILE = 256            # row block (lane axis of the in-kernel one-hot)
SEG_TILE = 512            # max resident segments per grid step (parallel axis)
_VMEM_LIMIT = 48 * 1024 * 1024


def _round_up(x, m):
    return ((x + m - 1) // m) * m


def _leaky_relu(x):
    return jnp.where(x > 0, x, x * NEG_SLOPE)


# ----------------------------------------------------------------------------
# Kernel 1: row-tiled dense layer  out = x @ w + b  (f32 accumulation).
# ----------------------------------------------------------------------------
def linear_kernel(x_ref, w_ref, b_ref, out_ref):
    acc = jnp.dot(x_ref[...], w_ref[...], preferred_element_type=jnp.float32)
    out_ref[...] = (acc + b_ref[...]).astype(out_ref.dtype)


def dense(x, w, b, out_dtype=jnp.float32, tm=256):
    n, d_in = x.shape
    d_out = w.shape[1]
    tm = min(tm, _round_up(n, 8))
    n_pad = _round_up(n, tm)
    x_p = jnp.pad(x, ((0, n_pad - n), (0, 0))) if n_pad != n else x
    out = pl.pallas_call(
        linear_kernel,
        out_shape=jax.ShapeDtypeStruct((n_pad, d_out), out_dtype),
        grid_spec=pltpu.PrefetchScalarGridSpec(
            num_scalar_prefetch=0,
            grid=(n_pad // tm,),
            in_specs=[pl.BlockSpec((tm, d_in), lambda i: (i, 0)),
                      pl.BlockSpec((d_in, d_out), lambda i: (0, 0)),
                      pl.BlockSpec((1, d_out), lambda i: (0, 0))],
            out_specs=pl.BlockSpec((tm, d_out), lambda i: (i, 0)),
        ),
        compiler_params=pltpu.CompilerParams(
            dimension_semantics=("parallel",),
            vmem_limit_bytes=32 * 1024 * 1024),
    )(x_p, w, b)
    return out[:n] if n_pad != n else out


# ----------------------------------------------------------------------------
# Kernel 2: WeightedAttentionPooling, (segment-block, row-block) grid with an
#           online per-segment softmax.  One-hot is built in-kernel from the
#           int32 index row; segments live on sublanes, rows on lanes.
#
#   h   : (tb, gate_hid + msg_hid)  pre-activation hidden (bf16)
#   idx : (1, tb)                   segment index of each row (-1 = padding)
#   pwl : (1, tb)                   pow * log(weights)  (f32)
#   out : (seg_tile, out_dim)       softmax-weighted segment sum of messages
# ----------------------------------------------------------------------------
def wap_pool_kernel(h_ref, idx_ref, pwl_ref, gw2t_ref, gb2_ref, mw2_ref, mb2_ref,
                    out_ref, m_sc, l_sc):
    s = pl.program_id(0)
    b = pl.program_id(1)
    seg_tile = out_ref.shape[0]
    tb = h_ref.shape[0]
    gate_hid = gw2t_ref.shape[1]

    @pl.when(b == 0)
    def _init():
        m_sc[...] = jnp.full(m_sc.shape, _MASK_VAL, m_sc.dtype)
        l_sc[...] = jnp.zeros(l_sc.shape, l_sc.dtype)
        out_ref[...] = jnp.zeros(out_ref.shape, out_ref.dtype)

    h = h_ref[...]                                    # (tb, gh+mh) bf16
    gh = _leaky_relu(h[:, :gate_hid])                 # (tb, gh)
    mh = _leaky_relu(h[:, gate_hid:])                 # (tb, mh)

    # in-kernel one-hot from the segment-index row (no HBM one-hot stream)
    idx = idx_ref[...]                                # (1, tb) int32
    seg0 = s * seg_tile
    seg_ids = lax.broadcasted_iota(jnp.int32, (seg_tile, tb), 0) + seg0
    mask = seg_ids == idx                             # (seg_tile, tb) bool
    oht = mask.astype(jnp.bfloat16)

    # gate logits along the lane axis: (1, tb) f32
    gate = lax.dot_general(gw2t_ref[...], gh, (((1,), (1,)), ((), ())),
                           preferred_element_type=jnp.float32) + gb2_ref[...]

    # --- online per-segment running max of the gate (scatter_max) -----------
    gate_b = gate.astype(jnp.bfloat16)                # bf16 select/reduce path
    masked = jnp.where(mask, gate_b, _MASK_VAL)       # (seg_tile, tb) bf16
    blk_max = jnp.max(masked, axis=1, keepdims=True).astype(jnp.float32)
    m_old = m_sc[...]                                 # (seg_tile, 1) f32
    m_new = jnp.maximum(m_old, blk_max)               # bf16-representable values
    corr = jnp.exp(m_old - m_new)
    m_sc[...] = m_new

    # gather each row's segment max back to the lane axis via a one-hot dot
    # (exact: each column of oht has at most one 1.0).
    row_max = lax.dot_general(m_new.astype(jnp.bfloat16), oht,
                              (((0,), (0,)), ((), ())),
                              preferred_element_type=jnp.float32)   # (1, tb)

    in_blk = (idx >= seg0) & (idx < seg0 + seg_tile)                # (1, tb)
    shift = jnp.where(in_blk, gate - row_max + pwl_ref[...], _MASK_VAL)
    p = jnp.exp(shift)                                # (1, tb) f32; 0 outside block
    p_b = p.astype(jnp.bfloat16)
    pw = oht * p_b                                    # (seg_tile, tb) bf16

    # message head: (tb, out_dim)
    msg = (jnp.dot(mh, mw2_ref[...], preferred_element_type=jnp.float32)
           + mb2_ref[...]).astype(jnp.bfloat16)

    # segment sums on the MXU: denominator and pooled numerator
    l_blk = lax.dot_general(oht, p_b, (((1,), (1,)), ((), ())),
                            preferred_element_type=jnp.float32)       # (seg_tile, 1)
    pooled = jnp.dot(pw, msg, preferred_element_type=jnp.float32)     # (seg_tile, out)

    l_sc[...] = corr * l_sc[...] + l_blk
    out_ref[...] = corr * out_ref[...] + pooled

    @pl.when(b == pl.num_programs(1) - 1)
    def _finalize():
        out_ref[...] = out_ref[...] / (l_sc[...] + 1e-10)   # exact divide


def wap_pool(h, seg_idx, weights, hp, n_seg):
    """WeightedAttentionPooling over `seg_idx` of pre-activation hidden `h`."""
    r, two_h = h.shape
    gate_hid = hp["gw2t"].shape[1]
    msg_hid = hp["mw2"].shape[0]
    out_dim = hp["mw2"].shape[1]

    tb = min(ROW_TILE, _round_up(r, 128))
    rp = _round_up(r, tb)
    pad = rp - r

    h_p = jnp.pad(h.astype(jnp.bfloat16), ((0, pad), (0, 0)))
    idx_p = jnp.pad(seg_idx.astype(jnp.int32), (0, pad),
                    constant_values=-1).reshape(1, rp)
    w_p = jnp.pad(weights.reshape(-1).astype(jnp.float32), (0, pad),
                  constant_values=1.0)
    w_p = jnp.maximum(w_p, 1e-30)                      # guard log(0)
    pwl = jnp.clip(hp["pow"].reshape(()) * jnp.log(w_p),
                   -80.0, 80.0).reshape(1, rp)          # keep exp finite in f32

    if n_seg <= SEG_TILE:
        seg_tile = _round_up(n_seg, 8)
        n_seg_pad = seg_tile
    else:
        seg_tile = SEG_TILE
        n_seg_pad = _round_up(n_seg, SEG_TILE)

    grid_spec = pltpu.PrefetchScalarGridSpec(
        num_scalar_prefetch=0,
        grid=(n_seg_pad // seg_tile, rp // tb),
        in_specs=[
            pl.BlockSpec((tb, two_h), lambda s, b: (b, 0)),           # hidden rows
            pl.BlockSpec((1, tb), lambda s, b: (0, b)),               # segment idx
            pl.BlockSpec((1, tb), lambda s, b: (0, b)),               # pow*log(w)
            pl.BlockSpec((1, gate_hid), lambda s, b: (0, 0)),         # gate W2^T
            pl.BlockSpec((1, 1), lambda s, b: (0, 0)),                # gate b2
            pl.BlockSpec((msg_hid, out_dim), lambda s, b: (0, 0)),    # msg W2
            pl.BlockSpec((1, out_dim), lambda s, b: (0, 0)),          # msg b2
        ],
        out_specs=pl.BlockSpec((seg_tile, out_dim), lambda s, b: (s, 0)),
        scratch_shapes=[pltpu.VMEM((seg_tile, 1), jnp.float32),       # running max
                        pltpu.VMEM((seg_tile, 1), jnp.float32)],      # running sum
    )
    out = pl.pallas_call(
        wap_pool_kernel,
        out_shape=jax.ShapeDtypeStruct((n_seg_pad, out_dim), jnp.float32),
        grid_spec=grid_spec,
        compiler_params=pltpu.CompilerParams(
            dimension_semantics=("parallel", "arbitrary"),   # segs || , rows = reduction
            vmem_limit_bytes=_VMEM_LIMIT),
    )(h_p, idx_p, pwl, hp["gw2t"], hp["gb2"], hp["mw2"], hp["mb2"])
    return out[:n_seg]


# ----------------------------------------------------------------------------
# Kernel 3: MeanPooling (scatter_mean) over aug_cry_idx (tiny; one-hot built
#           in-kernel from the int32 index row).
# ----------------------------------------------------------------------------
def mean_pool_kernel(x_ref, idx_ref, out_ref):
    n_aug = out_ref.shape[0]
    idx = idx_ref[...]                                       # (1, C) int32
    seg = lax.broadcasted_iota(jnp.int32, (n_aug, idx.shape[1]), 0)
    oh = (seg == idx).astype(jnp.float32)                    # (n_aug, C)
    sums = jnp.dot(oh, x_ref[...], preferred_element_type=jnp.float32)
    counts = jnp.sum(oh, axis=1, keepdims=True)
    out_ref[...] = sums / jnp.maximum(counts, 1.0)


def mean_pool(x, index, n_seg):
    f = x.shape[1]
    idx = index.astype(jnp.int32).reshape(1, -1)
    return pl.pallas_call(
        mean_pool_kernel,
        out_shape=jax.ShapeDtypeStruct((n_seg, f), jnp.float32),
        in_specs=[VMEM_SPEC, VMEM_SPEC],
        out_specs=VMEM_SPEC,
        compiler_params=pltpu.CompilerParams(vmem_limit_bytes=32 * 1024 * 1024),
    )(x, idx)


# ----------------------------------------------------------------------------
# Parameter init (deterministic, synthetic) -- fused / pre-transposed layouts.
# ----------------------------------------------------------------------------
def init_linear(key, d_in, d_out, scale=0.1):
    k1, k2 = jax.random.split(key)
    w = scale * jax.random.normal(k1, (d_in, d_out), jnp.float32)
    b = 0.01 * jax.random.normal(k2, (1, d_out), jnp.float32)
    return w, b


def _pack_wap(gw2, gb2, mw2, mb2, powp, w_node, b_node, ref):
    return dict(w_node=w_node.astype(jnp.bfloat16), b_node=b_node,
                gw2t=gw2.T.astype(jnp.bfloat16), gb2=gb2,
                mw2=mw2.astype(jnp.bfloat16), mb2=mb2, pow=powp, ref=ref)


def init_wap_pair(key, fea_len, gate_hid, msg_hid, out_dim):
    """WAP over cat(fea[self], fea[nbr]); first layers hoisted to the node domain."""
    k = jax.random.split(key, 5)
    gw1, gb1 = init_linear(k[0], 2 * fea_len, gate_hid)
    gw2, gb2 = init_linear(k[1], gate_hid, 1)
    mw1, mb1 = init_linear(k[2], 2 * fea_len, msg_hid)
    mw2, mb2 = init_linear(k[3], msg_hid, out_dim)
    powp = jax.random.normal(k[4], (1, 1), jnp.float32)
    # node-domain projection columns: [gate_self | msg_self | gate_nbr | msg_nbr]
    w_node = jnp.concatenate([gw1[:fea_len], mw1[:fea_len],
                              gw1[fea_len:], mw1[fea_len:]], axis=1)
    b_node = jnp.concatenate([gb1, mb1, jnp.zeros_like(gb1),
                              jnp.zeros_like(mb1)], axis=1)
    ref = dict(gw1=gw1, gb1=gb1, gw2=gw2, gb2=gb2,
               mw1=mw1, mb1=mb1, mw2=mw2, mb2=mb2, pow=powp)
    return _pack_wap(gw2, gb2, mw2, mb2, powp, w_node, b_node, ref)


def init_wap_node(key, fea_len, gate_hid, msg_hid, out_dim):
    """WAP whose input is fea itself (crystal pooling)."""
    k = jax.random.split(key, 5)
    gw1, gb1 = init_linear(k[0], fea_len, gate_hid)
    gw2, gb2 = init_linear(k[1], gate_hid, 1)
    mw1, mb1 = init_linear(k[2], fea_len, msg_hid)
    mw2, mb2 = init_linear(k[3], msg_hid, out_dim)
    powp = jax.random.normal(k[4], (1, 1), jnp.float32)
    w_node = jnp.concatenate([gw1, mw1], axis=1)
    b_node = jnp.concatenate([gb1, mb1], axis=1)
    ref = dict(gw1=gw1, gb1=gb1, gw2=gw2, gb2=gb2,
               mw1=mw1, mb1=mb1, mw2=mw2, mb2=mb2, pow=powp)
    return _pack_wap(gw2, gb2, mw2, mb2, powp, w_node, b_node, ref)


def init_descriptor_network(
    key, elem_emb_len, sym_emb_len,
    elem_fea_len=32, sym_fea_len=32, n_graph=3,
    elem_heads=1, elem_gate=(256,), elem_msg=(256,),
    cry_heads=1, cry_gate=(256,), cry_msg=(256,),
):
    fea_len = elem_fea_len + sym_fea_len
    keys = jax.random.split(key, 2 + n_graph * elem_heads + cry_heads)
    ki = iter(keys)

    # fused elem_embed + sym_embed + weight passthrough:
    #   [elem_fea | sym_fea | weights] @ W_embed + b_embed  -> (N, fea_len)
    ew, eb = init_linear(next(ki), elem_emb_len, elem_fea_len - 1)
    sw, sb = init_linear(next(ki), sym_emb_len, sym_fea_len)
    d_in = elem_emb_len + sym_emb_len + 1
    W_embed = jnp.zeros((d_in, fea_len), jnp.float32)
    W_embed = W_embed.at[:elem_emb_len, :elem_fea_len - 1].set(ew)
    W_embed = W_embed.at[elem_emb_len:elem_emb_len + sym_emb_len,
                         elem_fea_len - 1:fea_len - 1].set(sw)
    W_embed = W_embed.at[d_in - 1, fea_len - 1].set(1.0)
    b_embed = jnp.concatenate([eb, sb, jnp.zeros((1, 1), jnp.float32)], axis=1)

    graphs = []
    for _ in range(n_graph):
        graphs.append([init_wap_pair(next(ki), fea_len, elem_gate[0],
                                     elem_msg[0], fea_len)
                       for _ in range(elem_heads)])
    cry_pool = [init_wap_node(next(ki), fea_len, cry_gate[0], cry_msg[0], fea_len)
                for _ in range(cry_heads)]
    return dict(embed_w=W_embed, embed_b=b_embed, graphs=graphs, cry_pool=cry_pool)


# ----------------------------------------------------------------------------
# Forward pass (gathers / residual glue in XLA, hot path in Pallas kernels)
# ----------------------------------------------------------------------------
def descriptor_network_forward(
    params, elem_weights, elem_fea, sym_fea,
    self_fea_idx, nbr_fea_idx, cry_elem_idx, aug_cry_idx,
    n_cry, n_aug,
):
    n_elem = elem_fea.shape[0]

    # fused embedding + concat([elem, sym, weights]) -> lane-dense (N, 64)
    x_full = jnp.concatenate([elem_fea, sym_fea, elem_weights], axis=1)
    fea = dense(x_full, params["embed_w"], params["embed_b"], jnp.float32)

    nbr_w = jnp.take(elem_weights[:, 0], nbr_fea_idx, axis=0)        # (M,)

    # message passing layers
    for heads in params["graphs"]:
        head_outs = []
        for hp in heads:
            # hoisted first gate/message layers: one (N, 64) @ (64, 4*hid) matmul
            proj = dense(fea.astype(jnp.bfloat16), hp["w_node"], hp["b_node"],
                         jnp.bfloat16)                                # (N, 4*hid)
            half = proj.shape[1] // 2
            edge_h = (jnp.take(proj[:, :half], self_fea_idx, axis=0)
                      + jnp.take(proj[:, half:], nbr_fea_idx, axis=0))  # (M, 2*hid)
            head_outs.append(wap_pool(edge_h, self_fea_idx, nbr_w, hp, n_elem))
        fea = jnp.mean(jnp.stack(head_outs), axis=0) + fea            # residual

    # crystal attention pooling
    cry_outs = []
    for hp in params["cry_pool"]:
        h = dense(fea.astype(jnp.bfloat16), hp["w_node"], hp["b_node"],
                  jnp.bfloat16)                                       # (N, 2*hid)
        cry_outs.append(wap_pool(h, cry_elem_idx, elem_weights[:, 0], hp, n_cry))
    cry_fea = jnp.mean(jnp.stack(cry_outs), axis=0)                   # (C, fea_len)

    # augmentation mean pooling
    return mean_pool(cry_fea, aug_cry_idx, n_aug)                     # (A, fea_len)


# ----------------------------------------------------------------------------
# Pure-JAX f32 reference (matches the PyTorch module semantics) for validation.
# ----------------------------------------------------------------------------
def _wap_reference(x, index, weights, ref, n_seg):
    pw = ref["pow"].reshape(())
    gate = _leaky_relu(x @ ref["gw1"] + ref["gb1"]) @ ref["gw2"] + ref["gb2"]
    gate = gate[:, 0]
    smax = jax.ops.segment_max(gate, index, num_segments=n_seg)
    gate = gate - smax[index]
    gate = (weights ** pw) * jnp.exp(gate)
    denom = jax.ops.segment_sum(gate, index, num_segments=n_seg)
    gate = gate / (denom[index] + 1e-10)
    msg = _leaky_relu(x @ ref["mw1"] + ref["mb1"]) @ ref["mw2"] + ref["mb2"]
    return jax.ops.segment_sum(gate[:, None] * msg, index, num_segments=n_seg)


def descriptor_network_reference(params, elem_weights, elem_fea, sym_fea,
                                 self_idx, nbr_idx, cry_idx, aug_idx, n_cry, n_aug):
    x_full = jnp.concatenate([elem_fea, sym_fea, elem_weights], axis=1)
    fea = x_full @ params["embed_w"] + params["embed_b"]
    n_elem = fea.shape[0]
    nbr_w = elem_weights[nbr_idx, 0]
    for heads in params["graphs"]:
        outs = []
        for hp in heads:
            x = jnp.concatenate([fea[self_idx], fea[nbr_idx]], axis=1)
            outs.append(_wap_reference(x, self_idx, nbr_w, hp["ref"], n_elem))
        fea = jnp.mean(jnp.stack(outs), axis=0) + fea
    couts = [_wap_reference(fea, cry_idx, elem_weights[:, 0], hp["ref"], n_cry)
             for hp in params["cry_pool"]]
    cry_fea = jnp.mean(jnp.stack(couts), axis=0)
    sums = jax.ops.segment_sum(cry_fea, aug_idx, num_segments=n_aug)
    counts = jax.ops.segment_sum(jnp.ones((cry_fea.shape[0],), jnp.float32),
                                 aug_idx, num_segments=n_aug)
    return sums / jnp.maximum(counts, 1.0)[:, None]


# ----------------------------------------------------------------------------
# Demo
# ----------------------------------------------------------------------------
if __name__ == "__main__":
    key = jax.random.PRNGKey(0)

    # Small synthetic batch: C=3 crystals, 4 elements each -> N=12 nodes,
    # all ordered within-crystal pairs (i != j) -> M=36 edges, A=2 aug groups.
    elem_emb_len, sym_emb_len = 16, 16
    elems_per_cry = [4, 4, 4]
    n_cry = len(elems_per_cry)
    n_elem = sum(elems_per_cry)

    self_idx, nbr_idx, cry_idx = [], [], []
    offset = 0
    for c, ne in enumerate(elems_per_cry):
        for i in range(ne):
            cry_idx.append(c)
            for j in range(ne):
                if i != j:
                    self_idx.append(offset + i)
                    nbr_idx.append(offset + j)
        offset += ne
    self_fea_idx = jnp.array(self_idx, dtype=jnp.int32)
    nbr_fea_idx = jnp.array(nbr_idx, dtype=jnp.int32)
    cry_elem_idx = jnp.array(cry_idx, dtype=jnp.int32)
    aug_cry_idx = jnp.array([0, 0, 1], dtype=jnp.int32)
    n_aug = 2

    k1, k2, k3, k4 = jax.random.split(key, 4)
    elem_fea = jax.random.normal(k1, (n_elem, elem_emb_len), jnp.float32)
    sym_fea = jax.random.normal(k2, (n_elem, sym_emb_len), jnp.float32)
    # fractional stoichiometric weights: positive, normalized per crystal
    raw_w = jax.random.uniform(k3, (n_elem, 1), jnp.float32, 0.1, 1.0)
    seg_tot = jnp.take(
        jax.ops.segment_sum(raw_w[:, 0], cry_elem_idx, num_segments=n_cry),
        cry_elem_idx,
    )[:, None]
    elem_weights = raw_w / seg_tot

    params = init_descriptor_network(k4, elem_emb_len, sym_emb_len)

    out = descriptor_network_forward(
        params, elem_weights, elem_fea, sym_fea,
        self_fea_idx, nbr_fea_idx, cry_elem_idx, aug_cry_idx,
        n_cry=n_cry, n_aug=n_aug,
    )
    out = jax.block_until_ready(out)
    assert out.shape == (n_aug, 64) and bool(jnp.all(jnp.isfinite(out)))

    # validate against the pure-f32 reference (loose tol: bf16 MXU operands)
    ref = descriptor_network_reference(
        params, elem_weights, elem_fea, sym_fea,
        self_fea_idx, nbr_fea_idx, cry_elem_idx, aug_cry_idx, n_cry, n_aug)
    ref = jax.block_until_ready(ref)
    rel = float(jnp.max(jnp.abs(out - ref)) / (jnp.max(jnp.abs(ref)) + 1e-6))
    assert rel < 0.1, f"kernel deviates from f32 reference: rel={rel:.4f}"

    print("KERNEL_OK")
</pallas_src>

<mosaic_0001>
module attributes {stable_mosaic.version = 11 : i64} {
  func.func @linear_kernel(%arg0: i32, %arg1: memref<16x33xf32, #tpu.memory_space<vmem>>, %arg2: memref<33x64xf32, #tpu.memory_space<vmem>>, %arg3: memref<1x64xf32, #tpu.memory_space<vmem>>, %arg4: memref<16x64xf32, #tpu.memory_space<vmem>>) attributes {dimension_semantics = [#tpu.dimension_semantics<parallel>], iteration_bounds = array<i64: 1>, scalar_prefetch = 0 : i64, scratch_operands = 0 : i64, tpu.core_type = #tpu.core_type<tc>, window_params = [{transform_indices = @transform_0, window_bounds = array<i64: 16, 33>}, {pipeline_mode = #tpu.pipeline_mode<synchronous>, transform_indices = @transform_1, window_bounds = array<i64: 33, 64>}, {pipeline_mode = #tpu.pipeline_mode<synchronous>, transform_indices = @transform_2, window_bounds = array<i64: 1, 64>}, {transform_indices = @transform_3, window_bounds = array<i64: 16, 64>}]} {
    %c0 = arith.constant 0 : index
    %c0_0 = arith.constant 0 : index
    %0 = vector.load %arg1[%c0, %c0_0] : memref<16x33xf32, #tpu.memory_space<vmem>>, vector<16x33xf32>
    %c0_1 = arith.constant 0 : index
    %c0_2 = arith.constant 0 : index
    %1 = vector.load %arg2[%c0_1, %c0_2] : memref<33x64xf32, #tpu.memory_space<vmem>>, vector<33x64xf32>
    %cst = arith.constant dense<0.000000e+00> : vector<16x64xf32>
    %2 = tpu.matmul %0, %1, %cst {dimension_numbers = #tpu.dot_dimension_numbers<[1], [0], [0], [1], [0, 0, 1, 1], [], []>} : vector<16x33xf32>, vector<33x64xf32>, vector<16x64xf32> -> vector<16x64xf32>
    %c0_3 = arith.constant 0 : index
    %c0_4 = arith.constant 0 : index
    %3 = vector.load %arg3[%c0_3, %c0_4] : memref<1x64xf32, #tpu.memory_space<vmem>>, vector<1x64xf32>
    %4 = vector.broadcast %3 : vector<1x64xf32> to vector<16x64xf32>
    %5 = arith.addf %2, %4 : vector<16x64xf32>
    %c0_5 = arith.constant 0 : index
    %c0_6 = arith.constant 0 : index
    %6 = vector.load %arg4[%c0_5, %c0_6] : memref<16x64xf32, #tpu.memory_space<vmem>>, vector<16x64xf32>
    tpu.vector_store %arg4[%c0_5, %c0_6], %5 {strides = array<i32>} : memref<16x64xf32, #tpu.memory_space<vmem>>, vector<16x64xf32>,
    return
  }
  func.func @transform_0(%arg0: i32) -> (i32, i32) {
    %c0_i32 = arith.constant 0 : i32
    %c0_i32_0 = arith.constant 0 : i32
    return %arg0, %c0_i32 : i32, i32
  }
  func.func @transform_1(%arg0: i32) -> (i32, i32) {
    %c0_i32 = arith.constant 0 : i32
    %c0_i32_0 = arith.constant 0 : i32
    %c0_i32_1 = arith.constant 0 : i32
    return %c0_i32, %c0_i32_0 : i32, i32
  }
  func.func @transform_2(%arg0: i32) -> (i32, i32) {
    %c0_i32 = arith.constant 0 : i32
    %c0_i32_0 = arith.constant 0 : i32
    %c0_i32_1 = arith.constant 0 : i32
    return %c0_i32, %c0_i32_0 : i32, i32
  }
  func.func @transform_3(%arg0: i32) -> (i32, i32) {
    %c0_i32 = arith.constant 0 : i32
    %c0_i32_0 = arith.constant 0 : i32
    return %arg0, %c0_i32 : i32, i32
  }
}

</mosaic_0001>

<bundles_post_ra>
// kernel: tpu_custom_call.1
= control target key start
LH: loop header
LB: loop body
LE: loop exit
PB: predicated region body
PF: predicated region fallthrough
CT: control target
= control target key end

     0   :  { %8 = vsyncpa [#allocation3], 0  ;;  %s348_s0 = inlined_call_operand.hbm [shape: f32[16,33], index: 0, kind: input, shape index: {}]   ;;  %s349_s1 = inlined_call_operand.hbm [shape: f32[33,64], index: 1, kind: input, shape index: {}]   ;;  %s350_s2 = inlined_call_operand.vmem [shape: f32[1,64], index: 2, kind: input, shape index: {}]   ;;  %s351_s3 = inlined_call_operand.hbm [shape: f32[16,64], index: 3, kind: output, shape index: {}]  }
   0x1   :  { %9 = vsyncpa [#allocation6], 0 }
   0x2   :  { %10 = vsyncpa [#allocation4], 0  ;;  %s273_s12 = smov [#allocation2]   ;;  %s201_s16 = scalar_lea.hbm %s348_s0, 256 }
   0x3   :  { %s16_s13 = sshll.u32 %s273_s12, 4  ;;  %p202_p0 = scmp.ne.s32.totalorder %s348_s0, %s201_s16  ;;  %s17_s13 = int_to_ptr.vmem [resolvable:$true] %s16_s13 }
   0x4   :  { %p205_p1 = scmp.lt.u32.totalorder %s201_s16, %s348_s0 }
   0x6   :  { %p207_p2 = pnand %p205_p1, %p202_p0 }
   0x8   :  { %210 = shalt.err (!%p207_p2)
}
   0x9   :  { %s211_s21 = scalar_lea.vmem %s17_s13, 256  ;;  %p216_p4 = scmp.lt.s32.totalorder %s17_s13, %s17_s13 }
   0xa   :  { %p212_p3 = scmp.ne.s32.totalorder %s17_s13, %s211_s21  ;;  %p217_p5 = scmp.lt.s32.totalorder %s211_s21, %s211_s21 }
   0xc   :  { %p218_p6 = por %p217_p5, %p216_p4 }
   0xe   :  { %p219_p7 = pnand %p218_p6, %p212_p3 }
  0x10   :  { %222 = shalt.err (!%p219_p7)
}
  0x11   :  { %s274_s22 = smov 128   ;;  %s275_s23 = smov 8  }
  0x12   :  { %22 = dma.hbm_to_vmem [thread:$0]  %s348_s0, 256, %s17_s13, [#allocation3], %s274_s22, %s274_s22, %s275_s23  }
  0x13   :  { %s276_s26 = smov [#allocation5]   ;;  %s223_s30 = scalar_lea.hbm %s349_s1, 640 }
  0x14   :  { %s28_s27 = sshll.u32 %s276_s26, 4  ;;  %p224_p8 = scmp.ne.s32.totalorder %s349_s1, %s223_s30  ;;  %s29_s27 = int_to_ptr.vmem [resolvable:$true] %s28_s27 }
  0x15   :  { %p227_p9 = scmp.lt.u32.totalorder %s223_s30, %s349_s1 }
  0x17   :  { %p229_p10 = pnand %p227_p9, %p224_p8 }
  0x19   :  { %232 = shalt.err (!%p229_p10)
}
  0x1a   :  { %s233_s8 = scalar_lea.vmem %s29_s27, 640  ;;  %p238_p12 = scmp.lt.s32.totalorder %s29_s27, %s29_s27 }
  0x1b   :  { %p234_p11 = scmp.ne.s32.totalorder %s29_s27, %s233_s8  ;;  %p239_p13 = scmp.lt.s32.totalorder %s233_s8, %s233_s8 }
  0x1d   :  { %p240_p0 = por %p239_p13, %p238_p12 }
  0x1f   :  { %p241_p1 = pnand %p240_p0, %p234_p11 }
  0x21   :  { %244 = shalt.err (!%p241_p1)
}
  0x22   :  { %34 = dma.hbm_to_vmem [thread:$0]  %s349_s1, 640, %s29_s27, [#allocation6], %s274_s22, %s274_s22, %s275_s23  }
  0x23   :  { %267 = dma.done.wait [#allocation3], 256  }
  0x24   :  { %268 = vsyncadd [#allocation3], 4294967040 }
  0x25   :  { %269 = dma.done.wait [#allocation6], 640  }
  0x26   :  { %270 = vsyncadd [#allocation6], 4294966656  ;;  %vm57_vm0 = vcmask 269312   ;;  %v45_v0 = vld [vmem:[#allocation5] sm:$0xff]  ;;  %v46_v1 = vld [vmem:[#allocation5 + $0x8] sm:$0xff]  ;;  %vm64_vm1 = vcmask 1040384  }
  0x27   :  { %v47_v2 = vld [vmem:[#allocation5 + $0x10] sm:$0xff]  ;;  %v188_v3 = vpack.c.bf16 %v46_v1, %v45_v0  ;;  %v48_v4 = vld [vmem:[#allocation5 + $0x18] sm:$0xff]  ;;  %v49_v7 = vld [vmem:[#allocation5 + $0x20] sm:$0x1]  ;;  %s277_s11 = smov [#allocation7]   ;;  %vm143_vm2 = vcmask 523264  }
  0x28   :  { %v43_v5 = vld [vmem:[#allocation2] sm:$0xff]  ;;  %v192_v6 = vpack.c.bf16 %v48_v4, %v47_v2  ;;  %v44_v8 = vld [vmem:[#allocation2 + $0x8] sm:$0xff]  ;;  %s151_s12 = sshll.u32 %s277_s11, 4  ;;  %s152_s12 = int_to_ptr.vmem [resolvable:$true] %s151_s12 }
  0x29   :  { %185 = vmatprep.mubr.msk.f32.mxu0 %vm57_vm0, %v43_v5  ;;  %189 = vmatprep.subr.bf16.mxu0 %v188_v3  ;;  %v164_v9 = vld [vmem:[%s350_s2] ss:$0 sm:$0xff]  ;;  %s245_s13 = scalar_lea.vmem %s152_s12, 256  ;;  %p250_p3 = scmp.lt.s32.totalorder %s152_s12, %s152_s12 }
  0x2a   :  { %191 = vmatpush3.bf16.msra.mxu0 %v188_v3  ;;  %p246_p2 = scmp.ne.s32.totalorder %s152_s12, %s245_s13  ;;  %p251_p4 = scmp.lt.s32.totalorder %s245_s13, %s245_s13 }
  0x2b   :  { %193 = vmatprep.subr.bf16.mxu0 %v192_v6 }
  0x2c   :  { %p252_p5 = por %p251_p4, %p250_p3 }
  0x2e   :  { %195 = vmatpush3.bf16.msra.mxu0 %v192_v6  ;;  %p253_p6 = pnand %p252_p5, %p246_p2 }
  0x2f   :  { %183 = vmatprep.subr.msk.mxu0 %vm64_vm1, %v49_v7 }
  0x32   :  { %184 = vmatpush3.msk.msra.mxu0 %vm64_vm1, %v49_v7 }
  0x33   :  { %186 = vmatmul.mubr.msk.f32.vlgmr.msra.gmra.mrb[0].mxu0 %vm57_vm0, %v44_v8 }
 0x106   :  { %v187_v10 = vpop.f32.mrb[0].mxu0 }
 0x107   :  { %v140_v11 = vadd.f32 %v187_v10, %v164_v9  ;;  %v134_v12 = vpop.f32.mrb[1].mxu0 }
 0x108   :  { %v135_v13 = vadd.f32 %v164_v9, %v134_v12 }
 0x109   :  { %145 = vst.msk [vmem:[#allocation7 + $0x8] sm:$0xff] %vm143_vm2, %v140_v11 }
 0x10a   :  { %144 = vst.msk [vmem:[#allocation7] sm:$0xff] %vm143_vm2, %v135_v13 }
 0x10b   :  { %256 = shalt.err (!%p253_p6)
}
 0x10c   :  { %s257_s2 = scalar_lea.hbm %s351_s3, 256 }
 0x10d   :  { %p258_p7 = scmp.ne.s32.totalorder %s351_s3, %s257_s2  ;;  %p261_p8 = scmp.lt.u32.totalorder %s257_s2, %s351_s3 }
 0x10f   :  { %p263_p9 = pnand %p261_p8, %p258_p7 }
 0x111   :  { %266 = shalt.err (!%p263_p9)
}
 0x112   :  { %157 = dma.vmem_to_hbm [thread:$0]  %s152_s12, 256, %s351_s3, [#allocation4], %s274_s22, %s274_s22, %s275_s23  }
 0x113   :  { %271 = dma.done.wait [#allocation4], 256  }
 0x114   :  { %272 = vsyncadd [#allocation4], 4294967040 }
 0x115   :  { %161 = vsyncpa [#allocation3], 1 }
 0x116   :  { %162 = vsyncpa [#allocation6], 1 }
 0x117   :  { %163 = vsyncpa [#allocation4], 1 }

</bundles_post_ra>
